<compile_context>
chip_gen: v5e
topology: v5e:2x2
jax: 0.10.0
libtpu: 0.0.40
codegen_flags: <defaults>
</compile_context>

<pallas_src>
import functools
import math

import jax
import jax.numpy as jnp
from jax import lax
from jax.experimental import pallas as pl
from jax.experimental.pallas import tpu as pltpu


_LANE = 128


def _round_up(v, m):
    return ((v + m - 1) // m) * m


def _pad2(a, rows, cols):
    return jnp.pad(a, ((0, rows - a.shape[0]), (0, cols - a.shape[1])))


def _vmem_limit_bytes():
    # ~75% of physical VMEM, capped; conservative fallback if the query fails.
    try:
        cap = int(pltpu.get_tpu_info().vmem_capacity_bytes)
    except Exception:
        cap = 64 * 1024 * 1024
    return max(32 * 1024 * 1024, min(cap * 3 // 4, 96 * 1024 * 1024))


# ---------------- kernel 0: layer-1 projection --------------------------------
# Yl1 = X @ Wl1 (bf16 for the big aggregation matmul), Z1 = X @ Wr1 + b1 (f32)

def _proj1_kernel(x_ref, wl_ref, wr_ref, b_ref, yl_ref, z_ref):
    x = x_ref[...]
    yl_ref[...] = jnp.dot(x, wl_ref[...],
                          preferred_element_type=jnp.float32).astype(yl_ref.dtype)
    z_ref[...] = (jnp.dot(x, wr_ref[...], preferred_element_type=jnp.float32)
                  + b_ref[...])


# ---------------- kernel 1: aggregation + ReLU + dropout + normalize ----------
# acc += A[i,k] @ Yl1[k];  epilogue: h = inv_deg*acc + Z1; relu; dropout;
# emb = l2_normalize(h); also emits the fused layer-2 projections.

def _agg1_kernel(a_ref, yl_ref, z_ref, invd_ref, mask_ref,
                 wl2_ref, wr2_ref, b2_ref,
                 emb_ref, yl2_ref, z2_ref, acc_ref, *, drop_scale):
    k = pl.program_id(1)

    @pl.when(k == 0)
    def _():
        acc_ref[...] = jnp.zeros_like(acc_ref)

    acc_ref[...] += jnp.dot(a_ref[...], yl_ref[...],
                            preferred_element_type=jnp.float32)

    @pl.when(k == pl.num_programs(1) - 1)
    def _():
        # mean aggregation (exact f32 1/deg) + self/bias term (folded into Z1)
        h = acc_ref[...] * invd_ref[...] + z_ref[...]
        h = jnp.maximum(h, 0.0)                                    # ReLU
        h = h * (mask_ref[...].astype(jnp.float32) * drop_scale)   # dropout
        # F.normalize(p=2, dim=1): x / max(||x||, 1e-12); rsqrt on the EUP
        ss = jnp.sum(h * h, axis=1, keepdims=True)
        emb = h * lax.rsqrt(jnp.maximum(ss, 1e-24))
        emb_ref[...] = emb.astype(emb_ref.dtype)
        # fused layer-2 projections (consumed by the second aggregation kernel)
        emb_bf = emb.astype(jnp.bfloat16)
        yl2_ref[...] = jnp.dot(emb_bf, wl2_ref[...],
                               preferred_element_type=jnp.float32
                               ).astype(yl2_ref.dtype)
        z2_ref[...] = (jnp.dot(emb_bf, wr2_ref[...],
                               preferred_element_type=jnp.float32)
                       + b2_ref[...])


# ---------------- kernel 2: layer-2 aggregation --------------------------------

def _agg2_kernel(a_ref, yl_ref, z_ref, invd_ref, out_ref, acc_ref):
    k = pl.program_id(1)

    @pl.when(k == 0)
    def _():
        acc_ref[...] = jnp.zeros_like(acc_ref)

    acc_ref[...] += jnp.dot(a_ref[...], yl_ref[...],
                            preferred_element_type=jnp.float32)

    @pl.when(k == pl.num_programs(1) - 1)
    def _():
        out_ref[...] = (acc_ref[...] * invd_ref[...]
                        + z_ref[...]).astype(out_ref.dtype)


# ---------------- wrapper -------------------------------------------------------

def graphsage_forward(x, edge_index, params, keep_mask, dropout_p,
                      *, tile_rows=256, tile_k=512):
    """x: (N, F) f32; edge_index: (2, E) int32 (row0=src, row1=dst).
    keep_mask: (N, H) 0/1 dropout keep mask. Returns (embedding, out)."""
    N, F = x.shape
    H = params["wl1"].shape[1]
    O = params["wl2"].shape[1]

    f_pad = _round_up(F, _LANE)
    h_pad = _round_up(H, _LANE)
    o_pad = _round_up(O, _LANE)
    n_pad = _round_up(N, _LANE)          # lane-aligned adjacency width

    # ---- row tile: largest power of two <= tile_rows dividing n_pad with >=2
    #      tiles; prefer an even tile count (v7x megacore load balance).
    tm = 8
    for cand in (256, 128, 64, 32, 16, 8):
        if cand <= max(tile_rows, 8) and n_pad % cand == 0 and n_pad // cand >= 2:
            tm = cand
            break
    if (n_pad // tm) % 2 == 1 and tm > 8 and n_pad % (tm // 2) == 0:
        tm //= 2

    # ---- contraction tile: multiple of 128 dividing n_pad, capped so the
    #      double-buffered bf16 A slab stays within ~1/4 of the VMEM budget.
    vmem_limit = _vmem_limit_bytes()
    tk_cap = max(_LANE, ((vmem_limit // 4) // (2 * 2 * tm)) // _LANE * _LANE)
    tk = min(max(_LANE, tile_k), tk_cap, n_pad)
    tk = max(_LANE, tk // _LANE * _LANE)
    while n_pad % tk != 0:
        tk -= _LANE

    n_i, n_k = n_pad // tm, n_pad // tk

    # ---- exact integer-count adjacency (bf16) + f32 inverse degree
    # TODO(synk): for large graphs replace the dense O(N^2) adjacency with a
    # CSR scalar-prefetch gather kernel (O(E*H) traffic); fp8 A on v7x.
    src, dst = edge_index[0], edge_index[1]
    adj = jnp.zeros((n_pad, n_pad), jnp.float32).at[dst, src].add(1.0)
    deg = jnp.sum(adj, axis=1, keepdims=True)
    inv_deg = jnp.where(deg > 0, 1.0 / jnp.maximum(deg, 1.0), 0.0)  # (n_pad,1) f32
    a_mat = adj.astype(jnp.bfloat16)      # counts are small ints -> exact in bf16

    x_p = _pad2(x, n_pad, f_pad).astype(jnp.bfloat16)
    mask_p = _pad2(keep_mask, n_pad, h_pad).astype(jnp.bfloat16)    # 0/1 exact

    wl1 = _pad2(params["wl1"], f_pad, h_pad).astype(jnp.bfloat16)
    wr1 = _pad2(params["wr1"], f_pad, h_pad).astype(jnp.bfloat16)
    bl1 = _pad2(params["bl1"], 1, h_pad).astype(jnp.float32)
    wl2 = _pad2(params["wl2"], h_pad, o_pad).astype(jnp.bfloat16)
    wr2 = _pad2(params["wr2"], h_pad, o_pad).astype(jnp.bfloat16)
    bl2 = _pad2(params["bl2"], 1, o_pad).astype(jnp.float32)

    cp_rows = pltpu.CompilerParams(dimension_semantics=("parallel",),
                                   vmem_limit_bytes=vmem_limit)
    cp_agg = pltpu.CompilerParams(dimension_semantics=("parallel", "arbitrary"),
                                  vmem_limit_bytes=vmem_limit)

    # ---- kernel 0: layer-1 projection (O(N*F*H), tiny vs. the aggregations)
    yl1, z1 = pl.pallas_call(
        _proj1_kernel,
        out_shape=(jax.ShapeDtypeStruct((n_pad, h_pad), jnp.bfloat16),
                   jax.ShapeDtypeStruct((n_pad, h_pad), jnp.float32)),
        grid=(n_i,),
        in_specs=[
            pl.BlockSpec((tm, f_pad), lambda i: (i, 0)),
            pl.BlockSpec((f_pad, h_pad), lambda i: (0, 0)),
            pl.BlockSpec((f_pad, h_pad), lambda i: (0, 0)),
            pl.BlockSpec((1, h_pad), lambda i: (0, 0)),
        ],
        out_specs=(pl.BlockSpec((tm, h_pad), lambda i: (i, 0)),
                   pl.BlockSpec((tm, h_pad), lambda i: (i, 0))),
        compiler_params=cp_rows,
    )(x_p, wl1, wr1, bl1)

    # ---- kernel 1: aggregation 1 + ReLU + dropout + L2 normalize + layer-2 proj
    drop_scale = 0.0 if float(dropout_p) >= 1.0 else 1.0 / (1.0 - float(dropout_p))

    cost1 = pl.CostEstimate(
        flops=2 * n_pad * n_pad * h_pad + 4 * n_pad * h_pad * o_pad,
        transcendentals=n_pad,
        bytes_accessed=(a_mat.size * 2 + n_i * n_pad * h_pad * 2
                        + n_pad * h_pad * (4 + 2 + 4) + n_pad * o_pad * (2 + 4)))

    emb_p, yl2, z2 = pl.pallas_call(
        functools.partial(_agg1_kernel, drop_scale=drop_scale),
        out_shape=(jax.ShapeDtypeStruct((n_pad, h_pad), jnp.float32),
                   jax.ShapeDtypeStruct((n_pad, o_pad), jnp.bfloat16),
                   jax.ShapeDtypeStruct((n_pad, o_pad), jnp.float32)),
        grid=(n_i, n_k),
        in_specs=[
            pl.BlockSpec((tm, tk), lambda i, k: (i, k)),        # A slab (streamed)
            pl.BlockSpec((tk, h_pad), lambda i, k: (k, 0)),     # Yl1 (streamed)
            pl.BlockSpec((tm, h_pad), lambda i, k: (i, 0)),     # Z1 (per row tile)
            pl.BlockSpec((tm, 1), lambda i, k: (i, 0)),         # inv_deg
            pl.BlockSpec((tm, h_pad), lambda i, k: (i, 0)),     # dropout keep mask
            pl.BlockSpec((h_pad, o_pad), lambda i, k: (0, 0)),  # Wl2
            pl.BlockSpec((h_pad, o_pad), lambda i, k: (0, 0)),  # Wr2
            pl.BlockSpec((1, o_pad), lambda i, k: (0, 0)),      # b2
        ],
        out_specs=(pl.BlockSpec((tm, h_pad), lambda i, k: (i, 0)),
                   pl.BlockSpec((tm, o_pad), lambda i, k: (i, 0)),
                   pl.BlockSpec((tm, o_pad), lambda i, k: (i, 0))),
        scratch_shapes=[pltpu.VMEM((tm, h_pad), jnp.float32)],
        compiler_params=cp_agg,
        cost_estimate=cost1,
    )(a_mat, yl1, z1, inv_deg, mask_p, wl2, wr2, bl2)

    # ---- kernel 2: aggregation 2
    cost2 = pl.CostEstimate(
        flops=2 * n_pad * n_pad * o_pad,
        transcendentals=0,
        bytes_accessed=(a_mat.size * 2 + n_i * n_pad * o_pad * 2
                        + n_pad * o_pad * (4 + 4)))

    out_p = pl.pallas_call(
        _agg2_kernel,
        out_shape=jax.ShapeDtypeStruct((n_pad, o_pad), jnp.float32),
        grid=(n_i, n_k),
        in_specs=[
            pl.BlockSpec((tm, tk), lambda i, k: (i, k)),        # A slab
            pl.BlockSpec((tk, o_pad), lambda i, k: (k, 0)),     # Yl2
            pl.BlockSpec((tm, o_pad), lambda i, k: (i, 0)),     # Z2 (+ b2)
            pl.BlockSpec((tm, 1), lambda i, k: (i, 0)),         # inv_deg
        ],
        out_specs=pl.BlockSpec((tm, o_pad), lambda i, k: (i, 0)),
        scratch_shapes=[pltpu.VMEM((tm, o_pad), jnp.float32)],
        compiler_params=cp_agg,
        cost_estimate=cost2,
    )(a_mat, yl2, z2, inv_deg)

    return emb_p[:N, :H], out_p[:N, :O]


def init_params(key, feat_dim, hid_dim, out_dim):
    """Synthetic params mirroring SAGEConv (lin_l with bias, lin_r without)."""
    ks = jax.random.split(key, 4)
    s1 = 1.0 / math.sqrt(feat_dim)
    s2 = 1.0 / math.sqrt(hid_dim)
    return {
        # stored as (in, out) so the kernels avoid in-kernel transposes
        "wl1": jax.random.normal(ks[0], (feat_dim, hid_dim), jnp.float32) * s1,
        "bl1": jnp.zeros((1, hid_dim), jnp.float32),
        "wr1": jax.random.normal(ks[1], (feat_dim, hid_dim), jnp.float32) * s1,
        "wl2": jax.random.normal(ks[2], (hid_dim, out_dim), jnp.float32) * s2,
        "bl2": jnp.zeros((1, out_dim), jnp.float32),
        "wr2": jax.random.normal(ks[3], (hid_dim, out_dim), jnp.float32) * s2,
    }


if __name__ == "__main__":
    key = jax.random.PRNGKey(0)
    k_x, k_src, k_dst, k_par, k_drop = jax.random.split(key, 5)

    N, FEAT, HID, OUT = 128, 48, 64, 7
    E = 512
    p_drop = 0.5   # F.dropout defaults to training=True in the reference code

    x = jax.random.normal(k_x, (N, FEAT), jnp.float32)
    src = jax.random.randint(k_src, (E,), 0, N, dtype=jnp.int32)
    dst = jax.random.randint(k_dst, (E,), 0, N, dtype=jnp.int32)
    edge_index = jnp.stack([src, dst], axis=0)

    params = init_params(k_par, FEAT, HID, OUT)

    # Dropout keep-mask (stochastic part of F.dropout; scale applied in-kernel).
    keep_mask = (jax.random.uniform(k_drop, (N, HID)) >= p_drop).astype(jnp.float32)

    emb, out = graphsage_forward(x, edge_index, params, keep_mask, p_drop)
    jax.block_until_ready((emb, out))

    # ---- plain-JAX f32 reference (same forward semantics) ----
    adj = jnp.zeros((N, N), jnp.float32).at[dst, src].add(1.0)
    deg = adj.sum(axis=1, keepdims=True)
    a_norm = jnp.where(deg > 0, adj / jnp.maximum(deg, 1.0), 0.0)
    h_ref = a_norm @ x @ params["wl1"] + params["bl1"] + x @ params["wr1"]
    h_ref = jnp.maximum(h_ref, 0.0) * keep_mask * (1.0 / (1.0 - p_drop))
    nrm = jnp.maximum(jnp.sqrt(jnp.sum(h_ref * h_ref, axis=1, keepdims=True)), 1e-12)
    emb_ref = h_ref / nrm
    out_ref = (a_norm @ emb_ref @ params["wl2"] + params["bl2"]
               + emb_ref @ params["wr2"])

    assert emb.shape == (N, HID) and out.shape == (N, OUT)
    assert bool(jnp.all(jnp.isfinite(emb))) and bool(jnp.all(jnp.isfinite(out)))
    assert float(jnp.max(jnp.abs(emb - emb_ref))) < 5e-2
    assert float(jnp.max(jnp.abs(out - out_ref))) < 5e-2
    print("KERNEL_OK")
</pallas_src>

<mosaic_0001>
module attributes {stable_mosaic.version = 11 : i64} {
  func.func @_proj1_kernel(%arg0: i32, %arg1: memref<64x128xbf16, #tpu.memory_space<vmem>>, %arg2: memref<128x128xbf16, #tpu.memory_space<vmem>>, %arg3: memref<128x128xbf16, #tpu.memory_space<vmem>>, %arg4: memref<1x128xf32, #tpu.memory_space<vmem>>, %arg5: memref<64x128xbf16, #tpu.memory_space<vmem>>, %arg6: memref<64x128xf32, #tpu.memory_space<vmem>>) attributes {dimension_semantics = [#tpu.dimension_semantics<parallel>], iteration_bounds = array<i64: 2>, scalar_prefetch = 0 : i64, scratch_operands = 0 : i64, tpu.core_type = #tpu.core_type<tc>, window_params = [{transform_indices = @transform_0, window_bounds = array<i64: 64, 128>}, {pipeline_mode = #tpu.pipeline_mode<synchronous>, transform_indices = @transform_1, window_bounds = array<i64: 128, 128>}, {pipeline_mode = #tpu.pipeline_mode<synchronous>, transform_indices = @transform_2, window_bounds = array<i64: 128, 128>}, {pipeline_mode = #tpu.pipeline_mode<synchronous>, transform_indices = @transform_3, window_bounds = array<i64: 1, 128>}, {transform_indices = @transform_4, window_bounds = array<i64: 64, 128>}, {transform_indices = @transform_5, window_bounds = array<i64: 64, 128>}]} {
    %c0 = arith.constant 0 : index
    %c0_0 = arith.constant 0 : index
    %0 = vector.load %arg1[%c0, %c0_0] : memref<64x128xbf16, #tpu.memory_space<vmem>>, vector<64x128xbf16>
    %c0_1 = arith.constant 0 : index
    %c0_2 = arith.constant 0 : index
    %1 = vector.load %arg2[%c0_1, %c0_2] : memref<128x128xbf16, #tpu.memory_space<vmem>>, vector<128x128xbf16>
    %cst = arith.constant dense<0.000000e+00> : vector<64x128xf32>
    %2 = tpu.matmul %0, %1, %cst {dimension_numbers = #tpu.dot_dimension_numbers<[1], [0], [0], [1], [0, 0, 1, 1], [], []>} : vector<64x128xbf16>, vector<128x128xbf16>, vector<64x128xf32> -> vector<64x128xf32>
    %3 = arith.truncf %2 : vector<64x128xf32> to vector<64x128xbf16>
    %c0_3 = arith.constant 0 : index
    %c0_4 = arith.constant 0 : index
    %4 = vector.load %arg5[%c0_3, %c0_4] : memref<64x128xbf16, #tpu.memory_space<vmem>>, vector<64x128xbf16>
    tpu.vector_store %arg5[%c0_3, %c0_4], %3 {strides = array<i32>} : memref<64x128xbf16, #tpu.memory_space<vmem>>, vector<64x128xbf16>,
    %c0_5 = arith.constant 0 : index
    %c0_6 = arith.constant 0 : index
    %5 = vector.load %arg3[%c0_5, %c0_6] : memref<128x128xbf16, #tpu.memory_space<vmem>>, vector<128x128xbf16>
    %cst_7 = arith.constant dense<0.000000e+00> : vector<64x128xf32>
    %6 = tpu.matmul %0, %5, %cst_7 {dimension_numbers = #tpu.dot_dimension_numbers<[1], [0], [0], [1], [0, 0, 1, 1], [], []>} : vector<64x128xbf16>, vector<128x128xbf16>, vector<64x128xf32> -> vector<64x128xf32>
    %c0_8 = arith.constant 0 : index
    %c0_9 = arith.constant 0 : index
    %7 = vector.load %arg4[%c0_8, %c0_9] : memref<1x128xf32, #tpu.memory_space<vmem>>, vector<1x128xf32>
    %8 = vector.broadcast %7 : vector<1x128xf32> to vector<64x128xf32>
    %9 = arith.addf %6, %8 : vector<64x128xf32>
    %c0_10 = arith.constant 0 : index
    %c0_11 = arith.constant 0 : index
    %10 = vector.load %arg6[%c0_10, %c0_11] : memref<64x128xf32, #tpu.memory_space<vmem>>, vector<64x128xf32>
    tpu.vector_store %arg6[%c0_10, %c0_11], %9 {strides = array<i32>} : memref<64x128xf32, #tpu.memory_space<vmem>>, vector<64x128xf32>,
    return
  }
  func.func @transform_0(%arg0: i32) -> (i32, i32) {
    %c0_i32 = arith.constant 0 : i32
    %c0_i32_0 = arith.constant 0 : i32
    return %arg0, %c0_i32 : i32, i32
  }
  func.func @transform_1(%arg0: i32) -> (i32, i32) {
    %c0_i32 = arith.constant 0 : i32
    %c0_i32_0 = arith.constant 0 : i32
    %c0_i32_1 = arith.constant 0 : i32
    return %c0_i32, %c0_i32_0 : i32, i32
  }
  func.func @transform_2(%arg0: i32) -> (i32, i32) {
    %c0_i32 = arith.constant 0 : i32
    %c0_i32_0 = arith.constant 0 : i32
    %c0_i32_1 = arith.constant 0 : i32
    return %c0_i32, %c0_i32_0 : i32, i32
  }
  func.func @transform_3(%arg0: i32) -> (i32, i32) {
    %c0_i32 = arith.constant 0 : i32
    %c0_i32_0 = arith.constant 0 : i32
    %c0_i32_1 = arith.constant 0 : i32
    return %c0_i32, %c0_i32_0 : i32, i32
  }
  func.func @transform_4(%arg0: i32) -> (i32, i32) {
    %c0_i32 = arith.constant 0 : i32
    %c0_i32_0 = arith.constant 0 : i32
    return %arg0, %c0_i32 : i32, i32
  }
  func.func @transform_5(%arg0: i32) -> (i32, i32) {
    %c0_i32 = arith.constant 0 : i32
    %c0_i32_0 = arith.constant 0 : i32
    return %arg0, %c0_i32 : i32, i32
  }
}

</mosaic_0001>

<bundles_post_ra>
// kernel: tpu_custom_call.1
= control target key start
LH: loop header
LB: loop body
LE: loop exit
PB: predicated region body
PF: predicated region fallthrough
CT: control target
= control target key end

     0   :  { %11 = vsyncpa [#allocation3], 0  ;;  %s1383_s0 = inlined_call_operand.hbm [shape: bf16[128,128], index: 0, kind: input, shape index: {}]   ;;  %s1384_s1 = inlined_call_operand.hbm [shape: bf16[128,128], index: 1, kind: input, shape index: {}]   ;;  %s1385_s2 = inlined_call_operand.hbm [shape: bf16[128,128], index: 2, kind: input, shape index: {}]   ;;  %s1386_s3 = inlined_call_operand.vmem [shape: f32[1,128], index: 3, kind: input, shape index: {}]   ;;  %s1387_s4 = inlined_call_operand.hbm [shape: bf16[128,128], index: 4, kind: output, shape index: {0}]   ;;  %s1388_s5 = inlined_call_operand.hbm [shape: f32[128,128], index: 5, kind: output, shape index: {1}]  }
   0x1   :  { %13 = vsyncpa [#allocation3 + $0x1], 0 }
   0x2   :  { %14 = vsyncpa [#allocation6], 0 }
   0x3   :  { %15 = vsyncpa [#allocation4], 0 }
   0x4   :  { %17 = vsyncpa [#allocation4 + $0x1], 0 }
   0x5   :  { %18 = vsyncpa [#allocation10], 0 }
   0x6   :  { %20 = vsyncpa [#allocation10 + $0x1], 0  ;;  %s1176_s18 = smov 0   ;;  %s1178_s19 = smov 0  }
   0x7   :  { %s1180_s20 = smov 0   ;;  %s1182_s21 = smov 0  }
   0x8 LB: > { %s1197_s22 = sadd.s32 4294967295, %s1136_s21   ;;  %s701_s23 = sadd.s32 4294967294, %s1136_s21   ;;  %s1136_s21 = sphi %s1182_s21, %s1400_s21   ;;  %s1132_s20 = sphi %s1180_s20, %s1399_s20   ;;  %s1128_s19 = sphi %s1178_s19, %s1398_s19   ;;  %s1124_s18 = sphi %s1176_s18, %s1397_s18  }
   0x9   : > { %p46_p0 = scmp.ne.s32.totalorder %s1128_s19, %s1124_s18  ;;  %p47_p1 = scmp.eq.s32.totalorder %s1197_s22, 0 }
   0xa   : > { %p133_p2 = scmp.eq.s32.totalorder %s1197_s22, 1  ;;  %p139_p3 = scmp.eq.s32.totalorder %s701_s23, 1 }
   0xb   : > { %p1206_p4 = por %p47_p1, %p46_p0  ;;  %p702_p5 = scmp.ge.s32.totalorder %s1136_s21, 1 }
   0xc   : > { %p1211_p6 = por %p139_p3, %p46_p0  ;;  %p172_p7 = scmp.lt.s32.totalorder %s1136_s21, 3 }
   0xd   : > { %s183_s28 = sshll.u32 %s1384_s1, 4  ;;  %s1138_s30 = smov [#allocation5]   ;;  %s184_s28 = int_to_ptr.hbm [resolvable:$true] %s183_s28 }
   0xe   : > { %p1219_p8 = pnand %p702_p5, %p172_p7  ;;  %s185_s6 = sshll.u32 %s1138_s30, 4  ;;  %s186_s6 = int_to_ptr.vmem [resolvable:$true] %s185_s6 }
   0xf   : > { %s197_s9 = sshll.u32 %s1385_s2, 4  ;;  %s1389_s10 = smov 64   ;;  %s198_s9 = int_to_ptr.hbm [resolvable:$true] %s197_s9 }
  0x10   : > { %p879_p9 = pneg %p1219_p8  ;;  %s1140_s11 = smov 4  }
  0x11   : > { %s1141_s12 = smov [#allocation7]   ;;  %s1238_s14 = sadd.s32 1, %s1136_s21  }
  0x12   : > { %p880_p10 = pnand %p879_p9, %p47_p1  ;;  %s199_s13 = sshll.u32 %s1141_s12, 4  ;;  %s200_s13 = int_to_ptr.vmem [resolvable:$true] %s199_s13 }
  0x13   : > { %s33_s15 = sadd.s32 1, %s1132_s20  ;;  %s30_s16 = ssub.s32 %s1136_s21, %s1238_s14 }
  0x14   : > { %882 = dma.hbm_to_vmem [thread:$0]  (!%p880_p10), %s184_s28, 1024, %s186_s6, [#allocation6], %s1389_s10, %s1389_s10, %s1140_s11  }
  0x15   : > { %885 = dma.hbm_to_vmem [thread:$0]  (!%p880_p10), %s198_s9, 1024, %s200_s13, [#allocation6], %s1389_s10, %s1389_s10, %s1140_s11  }
  0x16   : > { %p40_p12 = scmp.ne.s32.totalorder %s1132_s20, %s1128_s19  ;;  %p31_p13 = scmp.eq.s32.totalorder %s30_s16, 0 }
  0x17   : > { %p41_p0 = scmp.eq.s32.totalorder %s1136_s21, 0  ;;  %p899_p5 = scmp.lt.s32.totalorder %s1136_s21, 2 }
  0x18   : > { %p1248_p3 = por %p133_p2, %p40_p12  ;;  %s216_s26 = sand.u32 1, %s1132_s20  }
  0x19   : > { %s1254_s23 = scalar_select %p31_p13, %s1132_s20, %s33_s15  }
  0x1a   : > { %p42_p7 = por %p41_p0, %p40_p12  ;;  %s706_s27 = sshll.u32 %s216_s26, 5 }
  0x1b   : > { %s803_s28 = sshll.u32 %s1136_s21, 5  ;;  %s220_s8 = scalar_lea.vmem [#allocation2], %s706_s27 }
  0x1c   : > { %s225_s7 = scalar_lea.hbm %s1383_s0, %s803_s28  ;;  %s228_s9 = sshll.u32 %s220_s8, 4  ;;  %s229_s9 = int_to_ptr.vmem [resolvable:$true] %s228_s9 }
  0x1d   : > { %s226_s12 = sshll.u32 %s225_s7, 4  ;;  %p1261_p2 = pnand %p899_p5, %p42_p7  ;;  %s227_s12 = int_to_ptr.hbm [resolvable:$true] %s226_s12 }
  0x1e   : > { %s217_s15 = scalar_lea.sflag [#allocation3], %s216_s26  ;;  %s1004_s16 = sshra.s32 %s227_s12, 4  ;;  %s1005_s16 = int_to_ptr.hbm [resolvable:$true] %s1004_s16 }
  0x1f   : > { %s1006_s10 = scalar_lea.hbm %s1005_s16, 32  ;;  %p1008_p10 = pneg %p1261_p2 }
  0x20   : > { %p1007_p9 = scmp.ne.s32.totalorder %s1005_s16, %s1006_s10  ;;  %s1011_s30 = scalar_lea.hbm %s1383_s0, 64 }
  0x21   : > { %p1012_p0 = scmp.lt.s32.totalorder %s1005_s16, %s1383_s0  ;;  %p1013_p5 = scmp.lt.s32.totalorder %s1011_s30, %s1006_s10 }
  0x22   : > { %p1009_p12 = pnand %p1008_p10, %p1007_p9 }
  0x23   : > { %p1014_p7 = por %p1013_p5, %p1012_p0 }
  0x24   : > { %p1010_p13 = pneg %p1009_p12 }
  0x26   : > { %p1015_p11 = pnand %p1014_p7, %p1010_p13 }
  0x28   : > { %1018 = shalt.err (!%p1015_p11)
}
  0x29   : > { %s1395_s26 = smov 64   ;;  %240 = sbr.rel (%p1219_p8) target bundleno = 257 (0x101), region = 36 }
  0x2a   : > { %889 = dma.hbm_to_vmem [thread:$0]  (!%p1261_p2), %s227_s12, 512, %s229_s9, %s217_s15, %s1395_s26, %s1395_s26, %s1140_s11  }
  0x2b   : > { %s1281_s8 = sand.u32 (!%p1219_p8), 1, %s1128_s19  }
  0x2c   : > { %s710_s10 = sshll.u32 (!%p1219_p8), %s1281_s8, 5  ;;  %s243_s16 = scalar_lea.sflag (!%p1219_p8), [#allocation3], %s1281_s8 }
  0x2d   : > { %s1287_s28 = scalar_lea.vmem (!%p1219_p8), [#allocation2], %s710_s10 }
  0x2e   : > { %1107 = dma.done.wait (%p1206_p4), %s243_s16, 512  }
  0x2f   : > { %1109 = vsyncadd (%p1206_p4), %s243_s16, 4294966784 }
  0x30   : > { %1111 = dma.done.wait (%p47_p1), [#allocation6], 2048  }
  0x31   : > { %1113 = vsyncadd (%p47_p1), [#allocation6], 4294965248  ;;  %v815_v0 = vld [vmem:[#allocation5 + $0x38] sm:$0xff]  ;;  %v814_v2 = vld [vmem:[#allocation5 + $0x30] sm:$0xff]  ;;  %s714_s24 = sshll.u32 %s1281_s8, 6  ;;  %s1311_s12 = scalar_lea.vmem [#allocation8], %s710_s10 }
  0x32   : > { %v823_v1 = vld [vmem:[#allocation7 + $0x38] sm:$0xff]  ;;  %388 = vmatpush.bf16.msra.mxu0 %v815_v0  ;;  %849 = vmatpush.bf16.msra.mxu2 %v815_v0  ;;  %v822_v3 = vld [vmem:[#allocation7 + $0x30] sm:$0xff]  ;;  %v813_v4 = vld [vmem:[#allocation5 + $0x28] sm:$0xff]  ;;  %s1305_s9 = scalar_lea.vmem [#allocation9], %s714_s24  ;;  %s824_s13 = sshll.u32 %s1197_s22, 5 }
  0x33   : > { %501 = vmatpush.bf16.msra.mxu1 %v823_v1  ;;  %857 = vmatpush.bf16.msra.mxu3 %v823_v1  ;;  %v821_v5 = vld [vmem:[#allocation7 + $0x28] sm:$0xff]  ;;  %v812_v6 = vld [vmem:[#allocation5 + $0x20] sm:$0xff]  ;;  %v811_v8 = vld [vmem:[#allocation5 + $0x18] sm:$0xff]  ;;  %s825_s15 = sshll.u32 %s1197_s22, 6  ;;  %s555_s6 = scalar_lea.hbm %s1387_s4, %s824_s13 }
  0x34   : > { %v820_v7 = vld [vmem:[#allocation7 + $0x20] sm:$0xff]  ;;  %v819_v9 = vld [vmem:[#allocation7 + $0x18] sm:$0xff]  ;;  %v810_v10 = vld [vmem:[#allocation5 + $0x10] sm:$0xff]  ;;  %s573_s7 = sshll.u32 %s1305_s9, 4  ;;  %s556_s26 = sshll.u32 %s1311_s12, 4  ;;  %s1330_s7 = int_to_ptr.vmem [resolvable:$true] %s573_s7  ;;  %s1333_s26 = int_to_ptr.vmem [resolvable:$true] %s556_s26 }
  0x35   : > { %v818_v11 = vld [vmem:[#allocation7 + $0x10] sm:$0xff]  ;;  %v809_v12 = vld [vmem:[#allocation5 + $0x8] sm:$0xff]  ;;  %v808_v14 = vld [vmem:[#allocation5] sm:$0xff]  ;;  %s558_s22 = sshll.u32 %s555_s6, 4  ;;  %s539_s29 = scalar_lea.sflag [#allocation4], %s1281_s8  ;;  %s559_s22 = int_to_ptr.hbm [resolvable:$true] %s558_s22 }
  0x36   : > { %389 = vmatpush.bf16.msra.mxu0 %v814_v2  ;;  %850 = vmatpush.bf16.msra.mxu2 %v814_v2  ;;  %v817_v13 = vld [vmem:[#allocation7 + $0x8] sm:$0xff]  ;;  %v816_v15 = vld [vmem:[#allocation7] sm:$0xff]  ;;  %v806_v17 = vld [vmem:[%s1287_s28 + $0x10] sm:$0xff]  ;;  %s1048_s11 = sshra.s32 %s559_s22, 4  ;;  %s1054_s30 = scalar_lea.hbm %s1387_s4, 64  ;;  %s1049_s11 = int_to_ptr.hbm [resolvable:$true] %s1048_s11 }
  0x37   : > { %502 = vmatpush.bf16.msra.mxu1 %v822_v3  ;;  %858 = vmatpush.bf16.msra.mxu3 %v822_v3  ;;  %v804_v16 = vld [vmem:[%s1287_s28] sm:$0xff]  ;;  %v805_v18 = vld [vmem:[%s1287_s28 + $0x8] sm:$0xff]  ;;  %v807_v19 = vld [vmem:[%s1287_s28 + $0x18] sm:$0xff]  ;;  %s572_s28 = scalar_lea.hbm %s1388_s5, %s825_s15  ;;  %s1050_s13 = scalar_lea.hbm %s1049_s11, 32 }
  0x38   : > { %v943_v20 = vld [vmem:[%s1386_s3] ss:$0 sm:$0xff]  ;;  %s575_s24 = sshll.u32 %s572_s28, 4  ;;  %p1051_p1 = scmp.ne.s32.totalorder %s1049_s11, %s1050_s13  ;;  %s1335_s24 = int_to_ptr.hbm [resolvable:$true] %s575_s24 }
  0x39   : > { %p1055_p11 = scmp.lt.s32.totalorder %s1049_s11, %s1387_s4  ;;  %p1056_p2 = scmp.lt.s32.totalorder %s1054_s30, %s1050_s13 }
  0x3a   : > { %390 = vmatpush.bf16.msra.mxu0 %v813_v4  ;;  %851 = vmatpush.bf16.msra.mxu2 %v813_v4  ;;  %p1052_p4 = pnand %p1051_p1, %p1248_p3 }
  0x3b   : > { %503 = vmatpush.bf16.msra.mxu1 %v821_v5  ;;  %859 = vmatpush.bf16.msra.mxu3 %v821_v5  ;;  %p1057_p9 = por %p1056_p2, %p1055_p11 }
  0x3c   : > { %p1053_p8 = pneg %p1052_p4 }
  0x3e   : > { %391 = vmatpush.bf16.msra.mxu0 %v812_v6  ;;  %852 = vmatpush.bf16.msra.mxu2 %v812_v6  ;;  %p1058_p10 = pnand %p1057_p9, %p1053_p8 }
  0x3f   : > { %504 = vmatpush.bf16.msra.mxu1 %v820_v7  ;;  %860 = vmatpush.bf16.msra.mxu3 %v820_v7 }
  0x42   : > { %392 = vmatpush.bf16.msra.mxu0 %v811_v8  ;;  %853 = vmatpush.bf16.msra.mxu2 %v811_v8 }
  0x43   : > { %505 = vmatpush.bf16.msra.mxu1 %v819_v9  ;;  %861 = vmatpush.bf16.msra.mxu3 %v819_v9 }
  0x46   : > { %393 = vmatpush.bf16.msra.mxu0 %v810_v10  ;;  %854 = vmatpush.bf16.msra.mxu2 %v810_v10 }
  0x47   : > { %506 = vmatpush.bf16.msra.mxu1 %v818_v11  ;;  %862 = vmatpush.bf16.msra.mxu3 %v818_v11 }
  0x4a   : > { %394 = vmatpush.bf16.msra.mxu0 %v809_v12  ;;  %855 = vmatpush.bf16.msra.mxu2 %v809_v12 }
  0x4b   : > { %507 = vmatpush.bf16.msra.mxu1 %v817_v13  ;;  %863 = vmatpush.bf16.msra.mxu3 %v817_v13 }
  0x4e   : > { %395 = vmatpush.bf16.msra.mxu0 %v808_v14  ;;  %856 = vmatpush.bf16.msra.mxu2 %v808_v14 }
  0x4f   : > { %508 = vmatpush.bf16.msra.mxu1 %v816_v15  ;;  %864 = vmatpush.bf16.msra.mxu3 %v816_v15 }
  0x51   : > { %396 = vmatmul.bf16.vlgmr.msra.gmra.mxu0 %v804_v16  ;;  %406 = vmatmul.bf16.vlgmr.msra.gmra.mxu2 %v806_v17 }
  0x52   : > { %509 = vmatmul.bf16.vlgmr.msra.gmra.mxu1 %v804_v16  ;;  %519 = vmatmul.bf16.vlgmr.msra.gmra.mxu3 %v806_v17 }
  0x61   : > { %401 = vmatmul.bf16.gmra.mxu0 %v805_v18  ;;  %411 = vmatmul.bf16.gmra.mxu2 %v807_v19 }
  0x62   : > { %514 = vmatmul.bf16.gmra.mxu1 %v805_v18  ;;  %524 = vmatmul.bf16.gmra.mxu3 %v807_v19 }
  0xce   : > { %v397_v21 = vpop.f32.mrf.mxu0 }
  0xcf   : > { %v510_v22 = vpop.f32.mrf.mxu1 }
  0xd0   : > { %v511_v23 = vadd.f32 %v943_v20, %v510_v22 }
  0xd2   : > { %530 = vst [vmem:[%s1305_s9] sm:$0xff] %v511_v23 }
  0xd4   : > { %v407_v24 = vpop.f32.mrf.mxu2 }
  0xd5   : > { %v520_v25 = vpop.f32.mrf.mxu3 }
  0xd6   : > { %v521_v26 = vadd.f32 %v943_v20, %v520_v25  ;;  %v399_v27 = vpop.f32.mrf.mxu0 }
  0xd7   : > { %v829_v28 = vpack.c.bf16 %v399_v27, %v397_v21  ;;  %v512_v29 = vpop.f32.mrf.mxu1 }
  0xd8   : > { %534 = vst [vmem:[%s1305_s9 + $0x20] sm:$0xff] %v521_v26  ;;  %v513_v30 = vadd.f32 %v943_v20, %v512_v29 }
  0xd9   : > { %830 = vst [vmem:[%s1311_s12] sm:$0xff] %v829_v28  }
  0xda   : > { %531 = vst [vmem:[%s1305_s9 + $0x8] sm:$0xff] %v513_v30 }
  0xdc   : > { %v409_v31 = vpop.f32.mrf.mxu2 }
  0xdd   : > { %v839_v32 = vpack.c.bf16 %v409_v31, %v407_v24  ;;  %v522_v33 = vpop.f32.mrf.mxu3 }
  0xde   : > { %v523_v34 = vadd.f32 %v943_v20, %v522_v33  ;;  %v402_v35 = vpop.f32.mrf.mxu0 }
  0xdf   : > { %847 = vst [vmem:[%s1311_s12 + $0x10] sm:$0xff] %v839_v32   ;;  %v515_v36 = vpop.f32.mrf.mxu1 }
  0xe0   : > { %535 = vst [vmem:[%s1305_s9 + $0x28] sm:$0xff] %v523_v34  ;;  %v516_v37 = vadd.f32 %v943_v20, %v515_v36 }
  0xe2   : > { %532 = vst [vmem:[%s1305_s9 + $0x10] sm:$0xff] %v516_v37 }
  0xe4   : > { %v412_v38 = vpop.f32.mrf.mxu2 }
  0xe5   : > { %v525_v39 = vpop.f32.mrf.mxu3 }
  0xe6   : > { %v526_v40 = vadd.f32 %v943_v20, %v525_v39  ;;  %v404_v41 = vpop.f32.mrf.mxu0 }
  0xe7   : > { %v834_v42 = vpack.c.bf16 %v404_v41, %v402_v35  ;;  %v517_v43 = vpop.f32.mrf.mxu1 }
  0xe8   : > { %536 = vst [vmem:[%s1305_s9 + $0x30] sm:$0xff] %v526_v40  ;;  %v518_v44 = vadd.f32 %v943_v20, %v517_v43 }
  0xe9   : > { %846 = vst [vmem:[%s1311_s12 + $0x8] sm:$0xff] %v834_v42  }
  0xea   : > { %533 = vst [vmem:[%s1305_s9 + $0x18] sm:$0xff] %v518_v44 }
  0xec   : > { %v414_v45 = vpop.f32.mrf.mxu2 }
  0xed   : > { %v844_v46 = vpack.c.bf16 %v414_v45, %v412_v38  ;;  %v527_v47 = vpop.f32.mrf.mxu3 }
  0xee   : > { %v528_v48 = vadd.f32 %v943_v20, %v527_v47 }
  0xef   : > { %848 = vst [vmem:[%s1311_s12 + $0x18] sm:$0xff] %v844_v46  }
  0xf0   : > { %537 = vst [vmem:[%s1305_s9 + $0x38] sm:$0xff] %v528_v48 }
  0xf1   : > { %1061 = shalt.err (!%p1058_p10)
}
  0xf2   : > { %s1142_s9 = smov 64   ;;  %s1143_s12 = smov 4  }
  0xf3   : > { %875 = dma.vmem_to_hbm [thread:$0]  (%p1248_p3), %s1333_s26, 512, %s559_s22, %s539_s29, %s1142_s9, %s1142_s9, %s1143_s12  }
  0xf4   : > { %s544_s16 = scalar_lea.sflag [#allocation10], %s1281_s8  ;;  %s1076_s28 = sshra.s32 %s1335_s24, 4  ;;  %s1077_s28 = int_to_ptr.hbm [resolvable:$true] %s1076_s28 }
  0xf5   : > { %s1078_s15 = scalar_lea.hbm %s1077_s28, 64  ;;  %s1082_s27 = scalar_lea.hbm %s1388_s5, 128 }
  0xf6   : > { %p1079_p12 = scmp.ne.s32.totalorder %s1077_s28, %s1078_s15  ;;  %p1083_p5 = scmp.lt.s32.totalorder %s1077_s28, %s1388_s5 }
  0xf7   : > { %p1084_p7 = scmp.lt.s32.totalorder %s1082_s27, %s1078_s15 }
  0xf8   : > { %p1080_p13 = pnand %p1079_p12, %p1248_p3 }
  0xf9   : > { %p1085_p1 = por %p1084_p7, %p1083_p5 }
  0xfa   : > { %p1081_p0 = pneg %p1080_p13 }
  0xfc   : > { %p1086_p4 = pnand %p1085_p1, %p1081_p0 }
  0xfe   : > { %1089 = shalt.err (!%p1086_p4)
}
  0xff   : > { %s1144_s8 = smov 128   ;;  %s1145_s26 = smov 8  }
 0x100   : > { %876 = dma.vmem_to_hbm [thread:$0]  (%p1248_p3), %s1330_s7, 1024, %s1335_s24, %s544_s16, %s1144_s8, %s1144_s8, %s1145_s26  }
 0x101 PF: > { %s590_s22 = sand.u32 1, %s1124_s18   ;;  %p1396_p8 = scmp.ge.s32.totalorder %s1136_s21, 2 }
 0x102   : > { %s591_s29 = scalar_lea.sflag [#allocation4], %s590_s22 }
 0x103   : > { %p891_p11 = pnand %p1396_p8, %p1211_p6 }
 0x105   : > { %p892_p2 = pneg %p891_p11 }
 0x107   : > { %1115 = dma.done.wait (%p892_p2), %s591_s29, 512  }
 0x108   : > { %1117 = vsyncadd (%p892_p2), %s591_s29, 4294966784  ;;  %s601_s10 = scalar_lea.sflag [#allocation10], %s590_s22 }
 0x109   : > { %1119 = dma.done.wait (%p892_p2), %s601_s10, 1024  }
 0x10a   : > { %1121 = vsyncadd (%p892_p2), %s601_s10, 4294966272  ;;  %p23_p3 = scmp.ge.s32.totalorder %s1238_s14, 4   ;;  %s1397_s18 = smov %s1128_s19 }
 0x10b   : > { %s1398_s19 = smov %s1132_s20  ;;  %s1399_s20 = smov %s1254_s23 }
 0x10c   : > { %s1400_s21 = smov %s1238_s14  ;;  %25 = sbr.rel (!%p23_p3) target bundleno = 8 (0x8), region = 106 }
 0x111   :  { %607 = vsyncpa [#allocation3], 1 }
 0x112   :  { %609 = vsyncpa [#allocation3 + $0x1], 1 }
 0x113   :  { %610 = vsyncpa [#allocation6], 1 }
 0x114   :  { %611 = vsyncpa [#allocation4], 1 }
 0x115   :  { %613 = vsyncpa [#allocation4 + $0x1], 1 }
 0x116   :  { %614 = vsyncpa [#allocation10], 1 }
 0x117   :  { %616 = vsyncpa [#allocation10 + $0x1], 1 }

</bundles_post_ra>
